<compile_context>
chip_gen: v7x
topology: tpu7x:2x2x1
jax: 0.10.0
libtpu: 0.0.40
codegen_flags: <defaults>
</compile_context>

<pallas_src>
import jax
import jax.numpy as jnp
from jax.experimental import pallas as pl
from jax.experimental.pallas import tpu as pltpu

HIDDEN = 256       # hidden width of l1/l2/l3
HEAD_W = 128       # width of the fused head weight (MXU-friendly; only 3 cols used)
HEAD_OUT = 8       # stored output columns: value/adv/q live in lanes 0/1/2
MAX_TILE_B = 1024  # max batch tile (multiple of 8)
STEP_COST_ROWS = 352  # ~0.35 us grid-step overhead expressed in "row equivalents"


def _round_up(x, m):
    return (x + m - 1) // m * m


def _choose_tiling(batch):
    """Pick (tile_b, padded_batch). Tiles are multiples of 8, at most MAX_TILE_B."""
    b8 = _round_up(max(batch, 1), 8)
    if b8 <= MAX_TILE_B:
        # Split medium batches in two so both v7x TensorCores get work.
        if b8 >= 512 and b8 % 16 == 0:
            return b8 // 2, b8
        return b8, b8
    # Large batch: trade pad waste (extra rows) against per-grid-step overhead.
    best = None
    for tb in range(128, MAX_TILE_B + 1, 8):
        b_pad = _round_up(b8, tb)
        cost = b_pad + (b_pad // tb) * STEP_COST_ROWS
        if best is None or cost < best[0]:
            best = (cost, tb, b_pad)
    return best[1], best[2]


def _dueling_critic_kernel(s_ref, a_ref, wfirst_ref, w23_ref, wh_ref, b_ref, out_ref):
    bf = jnp.bfloat16

    # packed biases (f32): rows 0/1/2 = b1/b2/b3, row 3 lanes [:HEAD_OUT] = head bias
    b1 = b_ref[0:1, :]
    b2 = b_ref[1:2, :]
    b3 = b_ref[2:3, :]
    bh = b_ref[3:4, 0:HEAD_OUT]

    # fused first layer:  [s | a] @ blockdiag(W1, W3a)  ->  [ s@W1 | a@W3a ]
    # (the concat is only sd+ad lanes wide -> cheap; zero blocks keep it exact)
    sa = jnp.concatenate([s_ref[...].astype(bf), a_ref[...].astype(bf)], axis=1)
    h01 = jnp.dot(sa, wfirst_ref[...], preferred_element_type=jnp.float32)   # (tb, 512)
    h1 = jnp.maximum(h01[:, :HIDDEN] + b1, 0.0)          # relu(l1(state))
    a_w3a = h01[:, HIDDEN:]                               # action @ W3a (f32)

    # feat = relu(h1 @ W2 + b2)        (packed trunk weight: cols [:256]=W2, [256:]=W3f)
    feat = jnp.dot(h1.astype(bf), w23_ref[:, :HIDDEN],
                   preferred_element_type=jnp.float32) + b2
    feat = jnp.maximum(feat, 0.0)
    feat_bf = feat.astype(bf)

    # h3 = relu(feat @ W3f + action @ W3a + b3)  == relu(l3(cat([feat, action])))
    h3 = jnp.dot(feat_bf, w23_ref[:, HIDDEN:],
                 preferred_element_type=jnp.float32) + a_w3a + b3
    h3 = jnp.maximum(h3, 0.0)

    # fused heads (no concat): two K=256 dots against the block-diag head weight.
    #   Wh col 0 = [wv; 0], col 1 = [0; wa], col 2 = [wv; wa]  => lanes 0/1/2 = value/adv/q
    head = (jnp.dot(feat_bf, wh_ref[:HIDDEN, :], preferred_element_type=jnp.float32)
            + jnp.dot(h3.astype(bf), wh_ref[HIDDEN:, :], preferred_element_type=jnp.float32))

    # narrow (tb, 8) store: 16x less HBM writeback than the old (tb, 128) slab
    out_ref[...] = head[:, :HEAD_OUT] + bh


def dueling_critic_forward(state, action, packed_params):
    """Forward pass of DuelingCritic. Returns (value, adv, value + adv), each (B, 1) f32."""
    w_first, w23, wh, b_pack = packed_params
    B, sd = state.shape
    ad = action.shape[1]

    tb, b_pad = _choose_tiling(B)
    if b_pad != B:  # pad only when the chosen tile does not divide the batch
        state = jnp.pad(state, ((0, b_pad - B), (0, 0)))
        action = jnp.pad(action, ((0, b_pad - B), (0, 0)))
    num_tiles = b_pad // tb

    out = pl.pallas_call(
        _dueling_critic_kernel,
        out_shape=jax.ShapeDtypeStruct((b_pad, HEAD_OUT), jnp.float32),
        grid=(num_tiles,),
        in_specs=[
            pl.BlockSpec((tb, sd), lambda i: (i, 0)),                   # state tile
            pl.BlockSpec((tb, ad), lambda i: (i, 0)),                   # action tile
            pl.BlockSpec((sd + ad, 2 * HIDDEN), lambda i: (0, 0)),      # blockdiag(W1, W3a)
            pl.BlockSpec((HIDDEN, 2 * HIDDEN), lambda i: (0, 0)),       # [W2 | W3f] (resident)
            pl.BlockSpec((2 * HIDDEN, HEAD_W), lambda i: (0, 0)),       # fused head weight
            pl.BlockSpec((4, HIDDEN), lambda i: (0, 0)),                # packed biases
        ],
        out_specs=pl.BlockSpec((tb, HEAD_OUT), lambda i: (i, 0)),
        compiler_params=pltpu.CompilerParams(
            dimension_semantics=("parallel",),
            vmem_limit_bytes=32 * 1024 * 1024),
    )(state, action, w_first, w23, wh, b_pack)

    value = out[:B, 0:1]
    adv = out[:B, 1:2]
    q = out[:B, 2:3]
    return value, adv, q


def init_params(key, state_dim, action_dim):
    """Synthetic parameters with the same shapes/init as the torch module (W as [in, out])."""
    ks = jax.random.split(key, 5)

    def lin(kw, fan_in, fan_out):
        bound = 1.0 / jnp.sqrt(fan_in)
        w = jax.random.uniform(kw, (fan_in, fan_out), jnp.float32, -bound, bound)
        b = jax.random.uniform(jax.random.fold_in(kw, 1), (1, fan_out),
                               jnp.float32, -bound, bound)
        return w, b

    w1, b1 = lin(ks[0], state_dim, HIDDEN)               # l1
    w2, b2 = lin(ks[1], HIDDEN, HIDDEN)                  # l2
    wv, bv = lin(ks[2], HIDDEN, 1)                       # lv
    w3, b3 = lin(ks[3], HIDDEN + action_dim, HIDDEN)     # l3 (acts on cat([feat, action]))
    wa, ba = lin(ks[4], HIDDEN, 1)                       # la
    return (w1, b1, w2, b2, wv, bv, w3, b3, wa, ba)


def pack_params(params):
    """Repack torch-style params into the kernel's bf16/f32 packed layout."""
    (w1, b1, w2, b2, wv, bv, w3, b3, wa, ba) = params
    bf = jnp.bfloat16
    sd = w1.shape[0]
    ad = w3.shape[0] - HIDDEN

    w3f, w3a = w3[:HIDDEN, :], w3[HIDDEN:, :]

    # block-diagonal fused first layer: [s | a] @ W_first == [s@W1 | a@W3a]
    w_first = jnp.zeros((sd + ad, 2 * HIDDEN), jnp.float32)
    w_first = w_first.at[:sd, :HIDDEN].set(w1)
    w_first = w_first.at[sd:, HIDDEN:].set(w3a)
    w_first = w_first.astype(bf)                                      # (sd+ad, 512)

    w23 = jnp.concatenate([w2, w3f], axis=1).astype(bf)               # (256, 512)

    # block-diagonal fused head weight (512, 128): col0=value, col1=adv, col2=q
    wh = jnp.zeros((2 * HIDDEN, HEAD_W), jnp.float32)
    wh = wh.at[:HIDDEN, 0].set(wv[:, 0])
    wh = wh.at[HIDDEN:, 1].set(wa[:, 0])
    wh = wh.at[:HIDDEN, 2].set(wv[:, 0])
    wh = wh.at[HIDDEN:, 2].set(wa[:, 0])
    wh = wh.astype(bf)

    bh = jnp.zeros((1, HIDDEN), jnp.float32)
    bh = bh.at[0, 0].set(bv[0, 0]).at[0, 1].set(ba[0, 0]).at[0, 2].set(bv[0, 0] + ba[0, 0])
    b_pack = jnp.concatenate([b1, b2, b3, bh], axis=0)                # (4, 256) f32

    return (w_first, w23, wh, b_pack)


def reference_forward(state, action, params):
    """Pure-JAX reference using the same bf16-operand / f32-accumulate recipe."""
    (w1, b1, w2, b2, wv, bv, w3, b3, wa, ba) = params
    bf = jnp.bfloat16

    def mm(x, w):
        return jnp.dot(x.astype(bf), w.astype(bf), preferred_element_type=jnp.float32)

    h1 = jax.nn.relu(mm(state, w1) + b1)
    feat = jax.nn.relu(mm(h1, w2) + b2)
    value = mm(feat, wv) + bv
    h3 = jax.nn.relu(mm(feat, w3[:HIDDEN]) + mm(action, w3[HIDDEN:]) + b3)
    adv = mm(h3, wa) + ba
    return value, adv, value + adv


if __name__ == "__main__":
    key = jax.random.PRNGKey(0)
    k_s, k_a, k_p = jax.random.split(key, 3)

    B, state_dim, action_dim = 8, 16, 8
    state = jax.random.normal(k_s, (B, state_dim), jnp.float32)
    action = jax.random.normal(k_a, (B, action_dim), jnp.float32)

    params = init_params(k_p, state_dim, action_dim)
    packed = pack_params(params)

    value, adv, q = dueling_critic_forward(state, action, packed)
    jax.block_until_ready((value, adv, q))

    v_ref, a_ref, q_ref = reference_forward(state, action, params)
    assert value.shape == (B, 1) and adv.shape == (B, 1) and q.shape == (B, 1)
    assert jnp.allclose(value, v_ref, atol=1e-3, rtol=1e-3)
    assert jnp.allclose(adv, a_ref, atol=1e-3, rtol=1e-3)
    assert jnp.allclose(q, q_ref, atol=1e-3, rtol=1e-3)

    print("KERNEL_OK")
</pallas_src>

<mosaic_0001>
module attributes {stable_mosaic.version = 11 : i64} {
  func.func @_dueling_critic_kernel(%arg0: i32, %arg1: memref<8x16xf32, #tpu.memory_space<vmem>>, %arg2: memref<8x8xf32, #tpu.memory_space<vmem>>, %arg3: memref<24x512xbf16, #tpu.memory_space<vmem>>, %arg4: memref<256x512xbf16, #tpu.memory_space<vmem>>, %arg5: memref<512x128xbf16, #tpu.memory_space<vmem>>, %arg6: memref<4x256xf32, #tpu.memory_space<vmem>>, %arg7: memref<8x8xf32, #tpu.memory_space<vmem>>) attributes {dimension_semantics = [#tpu.dimension_semantics<parallel>], iteration_bounds = array<i64: 1>, scalar_prefetch = 0 : i64, scratch_operands = 0 : i64, tpu.core_type = #tpu.core_type<tc>, window_params = [{transform_indices = @transform_0, window_bounds = array<i64: 8, 16>}, {transform_indices = @transform_1, window_bounds = array<i64: 8, 8>}, {pipeline_mode = #tpu.pipeline_mode<synchronous>, transform_indices = @transform_2, window_bounds = array<i64: 24, 512>}, {pipeline_mode = #tpu.pipeline_mode<synchronous>, transform_indices = @transform_3, window_bounds = array<i64: 256, 512>}, {pipeline_mode = #tpu.pipeline_mode<synchronous>, transform_indices = @transform_4, window_bounds = array<i64: 512, 128>}, {pipeline_mode = #tpu.pipeline_mode<synchronous>, transform_indices = @transform_5, window_bounds = array<i64: 4, 256>}, {transform_indices = @transform_6, window_bounds = array<i64: 8, 8>}]} {
    %c0 = arith.constant 0 : index
    %c0_0 = arith.constant 0 : index
    %0 = vector.load %arg6[%c0, %c0_0] : memref<4x256xf32, #tpu.memory_space<vmem>>, vector<1x256xf32>
    %c1 = arith.constant 1 : index
    %c0_1 = arith.constant 0 : index
    %1 = vector.load %arg6[%c1, %c0_1] : memref<4x256xf32, #tpu.memory_space<vmem>>, vector<1x256xf32>
    %c2 = arith.constant 2 : index
    %c0_2 = arith.constant 0 : index
    %2 = vector.load %arg6[%c2, %c0_2] : memref<4x256xf32, #tpu.memory_space<vmem>>, vector<1x256xf32>
    %c3 = arith.constant 3 : index
    %c0_3 = arith.constant 0 : index
    %3 = vector.load %arg6[%c3, %c0_3] : memref<4x256xf32, #tpu.memory_space<vmem>>, vector<1x8xf32>
    %c0_4 = arith.constant 0 : index
    %c0_5 = arith.constant 0 : index
    %4 = vector.load %arg1[%c0_4, %c0_5] : memref<8x16xf32, #tpu.memory_space<vmem>>, vector<8x16xf32>
    %5 = arith.truncf %4 : vector<8x16xf32> to vector<8x16xbf16>
    %c0_6 = arith.constant 0 : index
    %c0_7 = arith.constant 0 : index
    %6 = vector.load %arg2[%c0_6, %c0_7] : memref<8x8xf32, #tpu.memory_space<vmem>>, vector<8x8xf32>
    %7 = arith.truncf %6 : vector<8x8xf32> to vector<8x8xbf16>
    %8 = tpu.concatenate %5, %7 in 1 : vector<8x16xbf16>, vector<8x8xbf16> -> vector<8x24xbf16>
    %c0_8 = arith.constant 0 : index
    %c0_9 = arith.constant 0 : index
    %9 = vector.load %arg3[%c0_8, %c0_9] : memref<24x512xbf16, #tpu.memory_space<vmem>>, vector<24x512xbf16>
    %cst = arith.constant dense<0.000000e+00> : vector<8x512xf32>
    %10 = tpu.matmul %8, %9, %cst {dimension_numbers = #tpu.dot_dimension_numbers<[1], [0], [0], [1], [0, 0, 1, 1], [], []>} : vector<8x24xbf16>, vector<24x512xbf16>, vector<8x512xf32> -> vector<8x512xf32>
    %11 = vector.extract_strided_slice %10 {offsets = [0, 0], sizes = [8, 256], strides = [1, 1]} : vector<8x512xf32> to vector<8x256xf32>
    %12 = vector.broadcast %0 : vector<1x256xf32> to vector<8x256xf32>
    %13 = arith.addf %11, %12 : vector<8x256xf32>
    %cst_10 = arith.constant 0.000000e+00 : f32
    %14 = vector.broadcast %cst_10 : f32 to vector<8x256xf32>
    %15 = arith.maximumf %13, %14 : vector<8x256xf32>
    %16 = vector.extract_strided_slice %10 {offsets = [0, 256], sizes = [8, 256], strides = [1, 1]} : vector<8x512xf32> to vector<8x256xf32>
    %17 = arith.truncf %15 : vector<8x256xf32> to vector<8x256xbf16>
    %c0_11 = arith.constant 0 : index
    %c0_12 = arith.constant 0 : index
    %18 = vector.load %arg4[%c0_11, %c0_12] : memref<256x512xbf16, #tpu.memory_space<vmem>>, vector<256x256xbf16>
    %cst_13 = arith.constant dense<0.000000e+00> : vector<8x256xf32>
    %19 = tpu.matmul %17, %18, %cst_13 {dimension_numbers = #tpu.dot_dimension_numbers<[1], [0], [0], [1], [0, 0, 1, 1], [], []>} : vector<8x256xbf16>, vector<256x256xbf16>, vector<8x256xf32> -> vector<8x256xf32>
    %20 = vector.broadcast %1 : vector<1x256xf32> to vector<8x256xf32>
    %21 = arith.addf %19, %20 : vector<8x256xf32>
    %cst_14 = arith.constant 0.000000e+00 : f32
    %22 = vector.broadcast %cst_14 : f32 to vector<8x256xf32>
    %23 = arith.maximumf %21, %22 : vector<8x256xf32>
    %24 = arith.truncf %23 : vector<8x256xf32> to vector<8x256xbf16>
    %c0_15 = arith.constant 0 : index
    %c256 = arith.constant 256 : index
    %25 = vector.load %arg4[%c0_15, %c256] : memref<256x512xbf16, #tpu.memory_space<vmem>>, vector<256x256xbf16>
    %cst_16 = arith.constant dense<0.000000e+00> : vector<8x256xf32>
    %26 = tpu.matmul %24, %25, %cst_16 {dimension_numbers = #tpu.dot_dimension_numbers<[1], [0], [0], [1], [0, 0, 1, 1], [], []>} : vector<8x256xbf16>, vector<256x256xbf16>, vector<8x256xf32> -> vector<8x256xf32>
    %27 = arith.addf %26, %16 : vector<8x256xf32>
    %28 = vector.broadcast %2 : vector<1x256xf32> to vector<8x256xf32>
    %29 = arith.addf %27, %28 : vector<8x256xf32>
    %cst_17 = arith.constant 0.000000e+00 : f32
    %30 = vector.broadcast %cst_17 : f32 to vector<8x256xf32>
    %31 = arith.maximumf %29, %30 : vector<8x256xf32>
    %c0_18 = arith.constant 0 : index
    %c0_19 = arith.constant 0 : index
    %32 = vector.load %arg5[%c0_18, %c0_19] : memref<512x128xbf16, #tpu.memory_space<vmem>>, vector<256x128xbf16>
    %cst_20 = arith.constant dense<0.000000e+00> : vector<8x128xf32>
    %33 = tpu.matmul %24, %32, %cst_20 {dimension_numbers = #tpu.dot_dimension_numbers<[1], [0], [0], [1], [0, 0, 1, 1], [], []>} : vector<8x256xbf16>, vector<256x128xbf16>, vector<8x128xf32> -> vector<8x128xf32>
    %34 = arith.truncf %31 : vector<8x256xf32> to vector<8x256xbf16>
    %c256_21 = arith.constant 256 : index
    %c0_22 = arith.constant 0 : index
    %35 = vector.load %arg5[%c256_21, %c0_22] : memref<512x128xbf16, #tpu.memory_space<vmem>>, vector<256x128xbf16>
    %cst_23 = arith.constant dense<0.000000e+00> : vector<8x128xf32>
    %36 = tpu.matmul %34, %35, %cst_23 {dimension_numbers = #tpu.dot_dimension_numbers<[1], [0], [0], [1], [0, 0, 1, 1], [], []>} : vector<8x256xbf16>, vector<256x128xbf16>, vector<8x128xf32> -> vector<8x128xf32>
    %37 = arith.addf %33, %36 : vector<8x128xf32>
    %38 = vector.extract_strided_slice %37 {offsets = [0, 0], sizes = [8, 8], strides = [1, 1]} : vector<8x128xf32> to vector<8x8xf32>
    %39 = vector.broadcast %3 : vector<1x8xf32> to vector<8x8xf32>
    %40 = arith.addf %38, %39 : vector<8x8xf32>
    %c0_24 = arith.constant 0 : index
    %c0_25 = arith.constant 0 : index
    %41 = vector.load %arg7[%c0_24, %c0_25] : memref<8x8xf32, #tpu.memory_space<vmem>>, vector<8x8xf32>
    tpu.vector_store %arg7[%c0_24, %c0_25], %40 {strides = array<i32>} : memref<8x8xf32, #tpu.memory_space<vmem>>, vector<8x8xf32>,
    return
  }
  func.func @transform_0(%arg0: i32) -> (i32, i32) {
    %c0_i32 = arith.constant 0 : i32
    %c0_i32_0 = arith.constant 0 : i32
    return %arg0, %c0_i32 : i32, i32
  }
  func.func @transform_1(%arg0: i32) -> (i32, i32) {
    %c0_i32 = arith.constant 0 : i32
    %c0_i32_0 = arith.constant 0 : i32
    return %arg0, %c0_i32 : i32, i32
  }
  func.func @transform_2(%arg0: i32) -> (i32, i32) {
    %c0_i32 = arith.constant 0 : i32
    %c0_i32_0 = arith.constant 0 : i32
    %c0_i32_1 = arith.constant 0 : i32
    return %c0_i32, %c0_i32_0 : i32, i32
  }
  func.func @transform_3(%arg0: i32) -> (i32, i32) {
    %c0_i32 = arith.constant 0 : i32
    %c0_i32_0 = arith.constant 0 : i32
    %c0_i32_1 = arith.constant 0 : i32
    return %c0_i32, %c0_i32_0 : i32, i32
  }
  func.func @transform_4(%arg0: i32) -> (i32, i32) {
    %c0_i32 = arith.constant 0 : i32
    %c0_i32_0 = arith.constant 0 : i32
    %c0_i32_1 = arith.constant 0 : i32
    return %c0_i32, %c0_i32_0 : i32, i32
  }
  func.func @transform_5(%arg0: i32) -> (i32, i32) {
    %c0_i32 = arith.constant 0 : i32
    %c0_i32_0 = arith.constant 0 : i32
    %c0_i32_1 = arith.constant 0 : i32
    return %c0_i32, %c0_i32_0 : i32, i32
  }
  func.func @transform_6(%arg0: i32) -> (i32, i32) {
    %c0_i32 = arith.constant 0 : i32
    %c0_i32_0 = arith.constant 0 : i32
    return %arg0, %c0_i32 : i32, i32
  }
}

</mosaic_0001>

<bundles_post_ra>
// kernel: tpu_custom_call.1
= control target key start
LH: loop header
LB: loop body
LE: loop exit
PB: predicated region body
PF: predicated region fallthrough
CT: control target
= control target key end

     0   :  { %11 = vsyncpa [#allocation3], 0  ;;  %s1712_s0 = inlined_call_operand.hbm [shape: f32[8,16], index: 0, kind: input, shape index: {}]   ;;  %s1713_s1 = inlined_call_operand.hbm [shape: f32[8,8], index: 1, kind: input, shape index: {}]   ;;  %s1714_s2 = inlined_call_operand.hbm [shape: bf16[24,512], index: 2, kind: input, shape index: {}]   ;;  %s1715_s3 = inlined_call_operand.hbm [shape: bf16[256,512], index: 3, kind: input, shape index: {}]   ;;  %s1716_s4 = inlined_call_operand.hbm [shape: bf16[512,128], index: 4, kind: input, shape index: {}]   ;;  %s1717_s5 = inlined_call_operand.vmem [shape: f32[4,256], index: 5, kind: input, shape index: {}]   ;;  %s1718_s6 = inlined_call_operand.hbm [shape: f32[8,8], index: 6, kind: output, shape index: {}]  }
   0x1   :  { %12 = vsyncpa [#allocation6], 0 }
   0x2   :  { %13 = vsyncpa [#allocation9], 0 }
   0x3   :  { %14 = vsyncpa [#allocation4], 0  ;;  %s1559_s21 = smov [#allocation5]   ;;  %s1419_s25 = scalar_lea.hbm %s1713_s1, 128 }
   0x4   :  { %s31_s22 = sshll.u32 %s1559_s21, 4  ;;  %p1420_p0 = scmp.ne.s32.totalorder %s1713_s1, %s1419_s25  ;;  %s32_s22 = int_to_ptr.vmem [resolvable:$true] %s31_s22 }
   0x5   :  { %p1423_p1 = scmp.lt.u32.totalorder %s1419_s25, %s1713_s1 }
   0x7   :  { %p1425_p2 = pnand %p1423_p1, %p1420_p0 }
   0x9   :  { %1428 = shalt.err (!%p1425_p2)
}
   0xa   :  { %s1429_s30 = scalar_lea.vmem %s32_s22, 128  ;;  %p1434_p4 = scmp.lt.s32.totalorder %s32_s22, %s32_s22 }
   0xb   :  { %p1430_p3 = scmp.ne.s32.totalorder %s32_s22, %s1429_s30  ;;  %p1435_p5 = scmp.lt.s32.totalorder %s1429_s30, %s1429_s30 }
   0xd   :  { %p1436_p6 = por %p1435_p5, %p1434_p4 }
   0xf   :  { %p1437_p7 = pnand %p1436_p6, %p1430_p3 }
  0x11   :  { %1440 = shalt.err (!%p1437_p7)
}
  0x12   :  { %34 = dma.hbm_to_vmem [thread:$0]  %s1713_s1, 128, %s32_s22, [#allocation6]  }
  0x13   :  { %s1560_s9 = smov [#allocation8]   ;;  %s1561_s11 = smov [#allocation2]  }
  0x14   :  { %s52_s10 = sshll.u32 %s1560_s9, 4  ;;  %s21_s12 = sshll.u32 %s1561_s11, 4  ;;  %s53_s10 = int_to_ptr.vmem [resolvable:$true] %s52_s10  ;;  %s22_s12 = int_to_ptr.vmem [resolvable:$true] %s21_s12 }
  0x15   :  { %s1441_s15 = scalar_lea.hbm %s1715_s3, 8192 }
  0x16   :  { %p1442_p8 = scmp.ne.s32.totalorder %s1715_s3, %s1441_s15  ;;  %p1445_p9 = scmp.lt.u32.totalorder %s1441_s15, %s1715_s3 }
  0x18   :  { %p1447_p10 = pnand %p1445_p9, %p1442_p8 }
  0x1a   :  { %1450 = shalt.err (!%p1447_p10)
}
  0x1b   :  { %s1451_s1 = scalar_lea.vmem %s53_s10, 8192  ;;  %p1456_p12 = scmp.lt.s32.totalorder %s53_s10, %s53_s10 }
  0x1c   :  { %p1452_p11 = scmp.ne.s32.totalorder %s53_s10, %s1451_s1  ;;  %p1457_p13 = scmp.lt.s32.totalorder %s1451_s1, %s1451_s1 }
  0x1e   :  { %p1458_p0 = por %p1457_p13, %p1456_p12 }
  0x20   :  { %p1459_p1 = pnand %p1458_p0, %p1452_p11 }
  0x22   :  { %1462 = shalt.err (!%p1459_p1)
}
  0x23   :  { %s1562_s20 = smov 256   ;;  %s1563_s21 = smov 16  }
  0x24   :  { %58 = dma.hbm_to_vmem [thread:$0]  %s1715_s3, 8192, %s53_s10, [#allocation9], %s1562_s20, %s1562_s20, %s1563_s21  }
  0x25   :  { %s1463_s26 = scalar_lea.hbm %s1712_s0, 128 }
  0x26   :  { %p1464_p2 = scmp.ne.s32.totalorder %s1712_s0, %s1463_s26  ;;  %p1467_p3 = scmp.lt.u32.totalorder %s1463_s26, %s1712_s0 }
  0x28   :  { %p1469_p4 = pnand %p1467_p3, %p1464_p2 }
  0x2a   :  { %1472 = shalt.err (!%p1469_p4)
}
  0x2b   :  { %s1473_s7 = scalar_lea.vmem %s22_s12, 128  ;;  %p1478_p6 = scmp.lt.s32.totalorder %s22_s12, %s22_s12 }
  0x2c   :  { %p1474_p5 = scmp.ne.s32.totalorder %s22_s12, %s1473_s7  ;;  %p1479_p7 = scmp.lt.s32.totalorder %s1473_s7, %s1473_s7 }
  0x2e   :  { %p1480_p8 = por %p1479_p7, %p1478_p6 }
  0x30   :  { %p1481_p9 = pnand %p1480_p8, %p1474_p5 }
  0x32   :  { %1484 = shalt.err (!%p1481_p9)
}
  0x33   :  { %24 = dma.hbm_to_vmem [thread:$0]  %s1712_s0, 128, %s22_s12, [#allocation3]  }
  0x34   :  { %s1564_s9 = smov [#allocation7]   ;;  %s1565_s11 = smov [#allocation10]  }
  0x35   :  { %s40_s10 = sshll.u32 %s1564_s9, 4  ;;  %s64_s13 = sshll.u32 %s1565_s11, 4  ;;  %s41_s10 = int_to_ptr.vmem [resolvable:$true] %s40_s10  ;;  %s65_s13 = int_to_ptr.vmem [resolvable:$true] %s64_s13 }
  0x36   :  { %s1485_s16 = scalar_lea.hbm %s1714_s2, 768 }
  0x37   :  { %p1486_p10 = scmp.ne.s32.totalorder %s1714_s2, %s1485_s16  ;;  %p1489_p11 = scmp.lt.u32.totalorder %s1485_s16, %s1714_s2 }
  0x39   :  { %p1491_p12 = pnand %p1489_p11, %p1486_p10 }
  0x3b   :  { %1494 = shalt.err (!%p1491_p12)
}
  0x3c   :  { %s1495_s0 = scalar_lea.vmem %s41_s10, 768  ;;  %p1500_p0 = scmp.lt.s32.totalorder %s41_s10, %s41_s10 }
  0x3d   :  { %p1496_p13 = scmp.ne.s32.totalorder %s41_s10, %s1495_s0  ;;  %p1501_p1 = scmp.lt.s32.totalorder %s1495_s0, %s1495_s0 }
  0x3f   :  { %p1502_p2 = por %p1501_p1, %p1500_p0 }
  0x41   :  { %p1503_p3 = pnand %p1502_p2, %p1496_p13 }
  0x43   :  { %1506 = shalt.err (!%p1503_p3)
}
  0x44   :  { %46 = dma.hbm_to_vmem [thread:$0]  %s1714_s2, 768, %s41_s10, [#allocation6], %s1562_s20, %s1562_s20, %s1563_s21  }
  0x45   :  { %s1507_s25 = scalar_lea.hbm %s1716_s4, 4096 }
  0x46   :  { %p1508_p4 = scmp.ne.s32.totalorder %s1716_s4, %s1507_s25  ;;  %p1511_p5 = scmp.lt.u32.totalorder %s1507_s25, %s1716_s4 }
  0x48   :  { %p1513_p6 = pnand %p1511_p5, %p1508_p4 }
  0x4a   :  { %1516 = shalt.err (!%p1513_p6)
}
  0x4b   :  { %s1517_s30 = scalar_lea.vmem %s65_s13, 4096  ;;  %p1522_p8 = scmp.lt.s32.totalorder %s65_s13, %s65_s13 }
  0x4c   :  { %p1518_p7 = scmp.ne.s32.totalorder %s65_s13, %s1517_s30  ;;  %p1523_p9 = scmp.lt.s32.totalorder %s1517_s30, %s1517_s30 }
  0x4e   :  { %p1524_p10 = por %p1523_p9, %p1522_p8 }
  0x50   :  { %p1525_p11 = pnand %p1524_p10, %p1518_p7 }
  0x52   :  { %1528 = shalt.err (!%p1525_p11)
}
  0x53   :  { %s1566_s2 = smov 64   ;;  %s1567_s20 = smov 4  }
  0x54   :  { %70 = dma.hbm_to_vmem [thread:$0]  %s1716_s4, 4096, %s65_s13, [#allocation9], %s1566_s2, %s1566_s2, %s1567_s20  }
  0x55   :  { %1551 = dma.done.wait [#allocation3], 128  }
  0x56   :  { %1552 = vsyncadd [#allocation3], 4294967168 }
  0x57   :  { %1553 = dma.done.wait [#allocation6], 896  }
  0x58   :  { %1554 = vsyncadd [#allocation6], 4294966400 }
  0x59   :  { %1555 = dma.done.wait [#allocation9], 12288  }
  0x5a   :  { %1556 = vsyncadd [#allocation9], 4294955008  ;;  %v1568_v0 = vmov 0   ;;  %v97_v1 = vld [vmem:[#allocation5] sm:$0xff]  ;;  %v1281_v3 = vld [vmem:[#allocation7 + $0x4] ss:$16 sps:$4 sm:$0xff]  }
  0x5b   :  { %190 = vmatprep.mubr.bf16.mxu0 %v1568_v0  ;;  %231 = vmatprep.mubr.bf16.mxu1 %v1568_v0  ;;  %v98_v2 = vpack.c.bf16 %v97_v1, %v97_v1  ;;  %v1283_v4 = vld [vmem:[#allocation7 + $0xc] ss:$16 sps:$4 sm:$0xff]   ;;  %v1285_v5 = vld [vmem:[#allocation7] ss:$16 sps:$4 sm:$0xff]   ;;  %v1286_v6 = vld [vmem:[#allocation7 + $0x8] ss:$16 sps:$4 sm:$0xff]  }
  0x5c   :  { %158 = vmatprep.subr.bf16.mxu0 %v1281_v3  ;;  %v110_v7 = vld [vmem:[#allocation7 + $0x20] sm:$0xff]  ;;  %vm145_vm0 = vcmask 1043456   ;;  %v111_v8 = vld [vmem:[#allocation7 + $0x28] sm:$0xff]  ;;  %199 = vmatprep.subr.bf16.mxu1 %v1283_v4  ;;  %v95_v16 = vld [vmem:[#allocation2] sm:$0xff]  ;;  %vm102_vm1 = vcmask 130048   ;;  %vm142_vm2 = vcmask 195584  }
  0x5d   :  { %100 = vrot.lane.b32.xlu0 %v98_v2, %s1563_s21  ;;  %159 = vmatpush1.bf16.msra.mxu0 %v1285_v5  ;;  %v1122_v9 = vcombine.high %v110_v7, %v110_v7  ;;  %v1124_v10 = vcombine.high %v111_v8, %v111_v8  ;;  %v1121_v11 = vcombine.low %v110_v7, %v110_v7  ;;  %v1293_v13 = vld [vmem:[#allocation8 + $0x4] ss:$16 sps:$4 sm:$0xff]   ;;  %v1291_v18 = vld [vmem:[#allocation8] ss:$16 sps:$4 sm:$0xff]   ;;  %v1339_v51 = vld [vmem:[#allocation8 + $0x8] ss:$16 sps:$4 sm:$0xff]  }
  0x5e   :  { %200 = vmatpush1.bf16.msra.mxu1 %v1286_v6  ;;  %v1123_v12 = vcombine.low %v111_v8, %v111_v8  ;;  %v96_v17 = vpack.c.bf16 %v95_v16, %v95_v16  ;;  %v1296_v20 = vld [vmem:[#allocation8 + $0x24] ss:$16 sps:$4 sm:$0xff]   ;;  %v1294_v22 = vld [vmem:[#allocation8 + $0x20] ss:$16 sps:$4 sm:$0xff]   ;;  %v1341_v52 = vld [vmem:[#allocation8 + $0xc] ss:$16 sps:$4 sm:$0xff]  }
  0x5f   :  { %1125 = vmatprep.subr.msk.bf16.mxu0 %vm145_vm0, %v1122_v9  ;;  %1127 = vmatprep.subr.msk.bf16.mxu1 %vm145_vm0, %v1124_v10  ;;  %v147_v14 = vsel %vm145_vm0, %v1121_v11, 0  ;;  %v1299_v23 = vld [vmem:[#allocation8 + $0x44] ss:$16 sps:$4 sm:$0xff]   ;;  %v1297_v24 = vld [vmem:[#allocation8 + $0x40] ss:$16 sps:$4 sm:$0xff]   ;;  %s1569_s15 = smov [#allocation11]  }
  0x60   :  { %v153_v15 = vsel %vm145_vm0, %v1123_v12, 0  ;;  %v1302_v25 = vld [vmem:[#allocation8 + $0x64] ss:$16 sps:$4 sm:$0xff]   ;;  %v1300_v26 = vld [vmem:[#allocation8 + $0x60] ss:$16 sps:$4 sm:$0xff]   ;;  %s1104_s16 = sshll.u32 %s1569_s15, 4  ;;  %s1105_s16 = int_to_ptr.vmem [resolvable:$true] %s1104_s16 }
  0x61   :  { %161 = vmatpush1.bf16.msra.mxu0 %v147_v14  ;;  %v1305_v27 = vld [vmem:[#allocation8 + $0x84] ss:$16 sps:$4 sm:$0xff]   ;;  %v1303_v28 = vld [vmem:[#allocation8 + $0x80] ss:$16 sps:$4 sm:$0xff]   ;;  %v1344_v53 = vld [vmem:[#allocation8 + $0x2c] ss:$16 sps:$4 sm:$0xff]   ;;  %p1534_p13 = scmp.lt.s32.totalorder %s1105_s16, %s1105_s16 }
  0x62   :  { %202 = vmatpush1.bf16.msra.mxu1 %v153_v15  ;;  %460 = vmatprep.subr.bf16.mxu0 %v1293_v13  ;;  %v1308_v29 = vld [vmem:[#allocation8 + $0xa4] ss:$16 sps:$4 sm:$0xff]   ;;  %v1306_v30 = vld [vmem:[#allocation8 + $0xa0] ss:$16 sps:$4 sm:$0xff]   ;;  %v1342_v54 = vld [vmem:[#allocation8 + $0x28] ss:$16 sps:$4 sm:$0xff]   ;;  %v241_v15 = vlaneseq }
  0x63   :  { %v1311_v31 = vld [vmem:[#allocation8 + $0xc4] ss:$16 sps:$4 sm:$0xff]   ;;  %v1309_v32 = vld [vmem:[#allocation8 + $0xc0] ss:$16 sps:$4 sm:$0xff]   ;;  %697 = vmatprep.subr.bf16.mxu1 %v1341_v52  ;;  %v1347_v55 = vld [vmem:[#allocation8 + $0x4c] ss:$16 sps:$4 sm:$0xff]  }
  0x64   :  { %v1314_v33 = vld [vmem:[#allocation8 + $0xe4] ss:$16 sps:$4 sm:$0xff]   ;;  %v1312_v34 = vld [vmem:[#allocation8 + $0xe0] ss:$16 sps:$4 sm:$0xff]   ;;  %v1345_v56 = vld [vmem:[#allocation8 + $0x48] ss:$16 sps:$4 sm:$0xff]  }
  0x65   :  { %v1317_v35 = vld [vmem:[#allocation8 + $0x104] ss:$16 sps:$4 sm:$0xff]   ;;  %v1315_v36 = vld [vmem:[#allocation8 + $0x100] ss:$16 sps:$4 sm:$0xff]   ;;  %v1350_v57 = vld [vmem:[#allocation8 + $0x6c] ss:$16 sps:$4 sm:$0xff]  }
  0x66   :  { %v1320_v37 = vld [vmem:[#allocation8 + $0x124] ss:$16 sps:$4 sm:$0xff]   ;;  %v1318_v38 = vld [vmem:[#allocation8 + $0x120] ss:$16 sps:$4 sm:$0xff]   ;;  %v1348_v58 = vld [vmem:[#allocation8 + $0x68] ss:$16 sps:$4 sm:$0xff]  }
  0x67   :  { %v1323_v39 = vld [vmem:[#allocation8 + $0x144] ss:$16 sps:$4 sm:$0xff]   ;;  %v1321_v40 = vld [vmem:[#allocation8 + $0x140] ss:$16 sps:$4 sm:$0xff]   ;;  %v1353_v59 = vld [vmem:[#allocation8 + $0x8c] ss:$16 sps:$4 sm:$0xff]  }
  0x68   :  { %v1326_v41 = vld [vmem:[#allocation8 + $0x164] ss:$16 sps:$4 sm:$0xff]   ;;  %v1324_v42 = vld [vmem:[#allocation8 + $0x160] ss:$16 sps:$4 sm:$0xff]   ;;  %v1351_v60 = vld [vmem:[#allocation8 + $0x88] ss:$16 sps:$4 sm:$0xff]  }
  0x69   :  { %v1329_v43 = vld [vmem:[#allocation8 + $0x184] ss:$16 sps:$4 sm:$0xff]   ;;  %v1327_v44 = vld [vmem:[#allocation8 + $0x180] ss:$16 sps:$4 sm:$0xff]   ;;  %v1356_v61 = vld [vmem:[#allocation8 + $0xac] ss:$16 sps:$4 sm:$0xff]  }
  0x6a   :  { %v1332_v45 = vld [vmem:[#allocation8 + $0x1a4] ss:$16 sps:$4 sm:$0xff]   ;;  %v1330_v46 = vld [vmem:[#allocation8 + $0x1a0] ss:$16 sps:$4 sm:$0xff]   ;;  %v1354_v62 = vld [vmem:[#allocation8 + $0xa8] ss:$16 sps:$4 sm:$0xff]  }
  0x6b   :  { %v1335_v47 = vld [vmem:[#allocation8 + $0x1c4] ss:$16 sps:$4 sm:$0xff]   ;;  %v1333_v48 = vld [vmem:[#allocation8 + $0x1c0] ss:$16 sps:$4 sm:$0xff]   ;;  %v1359_v63 = vld [vmem:[#allocation8 + $0xcc] ss:$16 sps:$4 sm:$0xff]  }
  0x6c   :  { %v1338_v49 = vld [vmem:[#allocation8 + $0x1e4] ss:$16 sps:$4 sm:$0xff]   ;;  %v1336_v50 = vld [vmem:[#allocation8 + $0x1e0] ss:$16 sps:$4 sm:$0xff]   ;;  %v1357_v0 = vld [vmem:[#allocation8 + $0xc8] ss:$16 sps:$4 sm:$0xff]  }
  0x6d   :  { %v1362_v1 = vld [vmem:[#allocation8 + $0xec] ss:$16 sps:$4 sm:$0xff]   ;;  %v1360_v2 = vld [vmem:[#allocation8 + $0xe8] ss:$16 sps:$4 sm:$0xff]   ;;  %v242_v16 = vshrl.u32 %v241_v15, 7  ;;  %vm1096_vm3 = vcmask 64512  }
  0x6e   :  { %v1365_v3 = vld [vmem:[#allocation8 + $0x10c] ss:$16 sps:$4 sm:$0xff]   ;;  %v1363_v4 = vld [vmem:[#allocation8 + $0x108] ss:$16 sps:$4 sm:$0xff]   ;;  %s1529_s17 = scalar_lea.vmem %s1105_s16, 128 }
  0x6f   :  { %v1368_v5 = vld [vmem:[#allocation8 + $0x12c] ss:$16 sps:$4 sm:$0xff]   ;;  %v1366_v6 = vld [vmem:[#allocation8 + $0x128] ss:$16 sps:$4 sm:$0xff]   ;;  %p1530_p12 = scmp.ne.s32.totalorder %s1105_s16, %s1529_s17  ;;  %p1535_p0 = scmp.lt.s32.totalorder %s1529_s17, %s1529_s17 }
  0x70   :  { %v1371_v7 = vld [vmem:[#allocation8 + $0x14c] ss:$16 sps:$4 sm:$0xff]   ;;  %v1369_v8 = vld [vmem:[#allocation8 + $0x148] ss:$16 sps:$4 sm:$0xff]  }
  0x71   :  { %v1374_v9 = vld [vmem:[#allocation8 + $0x16c] ss:$16 sps:$4 sm:$0xff]   ;;  %v1372_v10 = vld [vmem:[#allocation8 + $0x168] ss:$16 sps:$4 sm:$0xff]   ;;  %p1536_p1 = por %p1535_p0, %p1534_p13 }
  0x72   :  { %v1377_v11 = vld [vmem:[#allocation8 + $0x18c] ss:$16 sps:$4 sm:$0xff]   ;;  %v1375_v12 = vld [vmem:[#allocation8 + $0x188] ss:$16 sps:$4 sm:$0xff]  }
  0x73   :  { %v1380_v13 = vld [vmem:[#allocation8 + $0x1ac] ss:$16 sps:$4 sm:$0xff]   ;;  %v1378_v14 = vld [vmem:[#allocation8 + $0x1a8] ss:$16 sps:$4 sm:$0xff]   ;;  %p1537_p2 = pnand %p1536_p1, %p1530_p12 }
  0x74   :  { %v1115_v52 = vld [vmem:[%s1717_s5 + $0x1] ss:$4 sm:$0x3]  ;;  %v1402_v15 = vld [vmem:[#allocation10 + $0x38] sm:$0xff]  }
  0xcf   :  { %v101_v19 = vpop.permute.xlu0 %100 }
  0xd0   :  { %v105_v21 = vsel %vm102_vm1, %v96_v17, %v101_v19  ;;  %v1672_v17 = vsub.s32 0, %v242_v16  ;;  %v1677_v19 = vsub.s32 1, %v242_v16  ;;  %v1414_v16 = vld [vmem:[#allocation10 + $0xa8] sm:$0xff]  }
  0xd1   :  { %1126 = vmatmul.mubr.msk.bf16.vlgmr.msra.gmra.mrb[0].mxu0 %vm142_vm2, %v105_v21  ;;  %1128 = vmatmul.mubr.msk.bf16.vlgmr.msra.gmra.mrb[0].mxu1 %vm142_vm2, %v105_v21 }
  0xd2   :  { %461 = vmatpush1.bf16.msra.mxu0 %v1291_v18  ;;  %698 = vmatpush1.bf16.msra.mxu1 %v1339_v51  ;;  %v89_v18 = vld [vmem:[%s1717_s5] ss:$4 sm:$0x3]  ;;  %v1413_v51 = vld [vmem:[#allocation10 + $0xe8] sm:$0xff]  }
  0xd3   :  { %462 = vmatprep.subr.bf16.mxu0 %v1296_v20  ;;  %699 = vmatprep.subr.bf16.mxu1 %v1344_v53  ;;  %v244_v20 = vrot.slane %v89_v18, %v1672_v17  ;;  %v248_v21 = vrot.slane %v89_v18, %v1677_v19  ;;  %v293_v53 = vrot.slane %v1115_v52, %v1672_v17  ;;  %v1415_v18 = vld [vmem:[#allocation10 + $0xf0] sm:$0xff]  }
  0xd6   :  { %463 = vmatpush1.bf16.msra.mxu0 %v1294_v22  ;;  %700 = vmatpush1.bf16.msra.mxu1 %v1342_v54  ;;  %v297_v54 = vrot.slane %v1115_v52, %v1677_v19 }
  0xd7   :  { %464 = vmatprep.subr.bf16.mxu0 %v1299_v23  ;;  %701 = vmatprep.subr.bf16.mxu1 %v1347_v55 }
  0xda   :  { %465 = vmatpush1.bf16.msra.mxu0 %v1297_v24  ;;  %702 = vmatpush1.bf16.msra.mxu1 %v1345_v56 }
  0xdb   :  { %466 = vmatprep.subr.bf16.mxu0 %v1302_v25  ;;  %703 = vmatprep.subr.bf16.mxu1 %v1350_v57 }
  0xde   :  { %467 = vmatpush1.bf16.msra.mxu0 %v1300_v26  ;;  %704 = vmatpush1.bf16.msra.mxu1 %v1348_v58 }
  0xdf   :  { %468 = vmatprep.subr.bf16.mxu0 %v1305_v27  ;;  %705 = vmatprep.subr.bf16.mxu1 %v1353_v59 }
  0xe2   :  { %469 = vmatpush1.bf16.msra.mxu0 %v1303_v28  ;;  %706 = vmatpush1.bf16.msra.mxu1 %v1351_v60 }
  0xe3   :  { %470 = vmatprep.subr.bf16.mxu0 %v1308_v29  ;;  %707 = vmatprep.subr.bf16.mxu1 %v1356_v61 }
  0xe6   :  { %471 = vmatpush1.bf16.msra.mxu0 %v1306_v30  ;;  %708 = vmatpush1.bf16.msra.mxu1 %v1354_v62 }
  0xe7   :  { %472 = vmatprep.subr.bf16.mxu0 %v1311_v31  ;;  %709 = vmatprep.subr.bf16.mxu1 %v1359_v63 }
  0xea   :  { %473 = vmatpush1.bf16.msra.mxu0 %v1309_v32  ;;  %710 = vmatpush1.bf16.msra.mxu1 %v1357_v0  ;;  %v1388_v0 = vld [vmem:[#allocation10] sm:$0xff]  }
  0xeb   :  { %474 = vmatprep.subr.bf16.mxu0 %v1314_v33  ;;  %711 = vmatprep.subr.bf16.mxu1 %v1362_v1 }
  0xee   :  { %475 = vmatpush1.bf16.msra.mxu0 %v1312_v34  ;;  %712 = vmatpush1.bf16.msra.mxu1 %v1360_v2  ;;  %v1389_v2 = vld [vmem:[#allocation10 + $0x48] sm:$0xff]  }
  0xef   :  { %476 = vmatprep.subr.bf16.mxu0 %v1317_v35  ;;  %713 = vmatprep.subr.bf16.mxu1 %v1365_v3  ;;  %v1390_v3 = vld [vmem:[#allocation10 + $0x8] sm:$0xff]  }
  0xf2   :  { %477 = vmatpush1.bf16.msra.mxu0 %v1315_v36  ;;  %714 = vmatpush1.bf16.msra.mxu1 %v1363_v4  ;;  %v1383_v36 = vld [vmem:[#allocation8 + $0x1cc] ss:$16 sps:$4 sm:$0xff]   ;;  %v1391_v4 = vld [vmem:[#allocation10 + $0x50] sm:$0xff]  }
  0xf3   :  { %478 = vmatprep.subr.bf16.mxu0 %v1320_v37  ;;  %715 = vmatprep.subr.bf16.mxu1 %v1368_v5  ;;  %v1381_v37 = vld [vmem:[#allocation8 + $0x1c8] ss:$16 sps:$4 sm:$0xff]   ;;  %v1392_v5 = vld [vmem:[#allocation10 + $0x10] sm:$0xff]  }
  0xf6   :  { %479 = vmatpush1.bf16.msra.mxu0 %v1318_v38  ;;  %716 = vmatpush1.bf16.msra.mxu1 %v1366_v6  ;;  %v1386_v38 = vld [vmem:[#allocation8 + $0x1ec] ss:$16 sps:$4 sm:$0xff]  }
  0xf7   :  { %480 = vmatprep.subr.bf16.mxu0 %v1323_v39  ;;  %717 = vmatprep.subr.bf16.mxu1 %v1371_v7  ;;  %v1384_v39 = vld [vmem:[#allocation8 + $0x1e8] ss:$16 sps:$4 sm:$0xff]  }
  0xf8   :  { %v1393_v6 = vld [vmem:[#allocation10 + $0x58] sm:$0xff]  }
  0xf9   :  { %v1394_v7 = vld [vmem:[#allocation10 + $0x18] sm:$0xff]  }
  0xfa   :  { %481 = vmatpush1.bf16.msra.mxu0 %v1321_v40  ;;  %718 = vmatpush1.bf16.msra.mxu1 %v1369_v8  ;;  %v1387_v40 = vld [vmem:[#allocation10 + $0x40] sm:$0xff]  }
  0xfb   :  { %482 = vmatprep.subr.bf16.mxu0 %v1326_v41  ;;  %719 = vmatprep.subr.bf16.mxu1 %v1374_v9  ;;  %v1403_v41 = vld [vmem:[#allocation10 + $0xc0] sm:$0xff]  }
  0xfc   :  { %v1395_v8 = vld [vmem:[#allocation10 + $0x60] sm:$0xff]  }
  0xfd   :  { %v1396_v9 = vld [vmem:[#allocation10 + $0x20] sm:$0xff]  }
  0xfe   :  { %483 = vmatpush1.bf16.msra.mxu0 %v1324_v42  ;;  %720 = vmatpush1.bf16.msra.mxu1 %v1372_v10  ;;  %v1404_v42 = vld [vmem:[#allocation10 + $0x80] sm:$0xff]   ;;  %v1397_v10 = vld [vmem:[#allocation10 + $0x68] sm:$0xff]  }
  0xff   :  { %484 = vmatprep.subr.bf16.mxu0 %v1329_v43  ;;  %721 = vmatprep.subr.bf16.mxu1 %v1377_v11  ;;  %v1405_v43 = vld [vmem:[#allocation10 + $0xc8] sm:$0xff]  }
 0x100   :  { %v1398_v11 = vld [vmem:[#allocation10 + $0x28] sm:$0xff]  }
 0x102   :  { %485 = vmatpush1.bf16.msra.mxu0 %v1327_v44  ;;  %722 = vmatpush1.bf16.msra.mxu1 %v1375_v12  ;;  %v1406_v44 = vld [vmem:[#allocation10 + $0x88] sm:$0xff]   ;;  %v1399_v12 = vld [vmem:[#allocation10 + $0x70] sm:$0xff]  }
 0x103   :  { %486 = vmatprep.subr.bf16.mxu0 %v1332_v45  ;;  %723 = vmatprep.subr.bf16.mxu1 %v1380_v13  ;;  %v1407_v45 = vld [vmem:[#allocation10 + $0xd0] sm:$0xff]  }
 0x104   :  { %v1400_v13 = vld [vmem:[#allocation10 + $0x30] sm:$0xff]  }
 0x106   :  { %487 = vmatpush1.bf16.msra.mxu0 %v1330_v46  ;;  %724 = vmatpush1.bf16.msra.mxu1 %v1378_v14  ;;  %v1408_v46 = vld [vmem:[#allocation10 + $0x90] sm:$0xff]   ;;  %v1401_v14 = vld [vmem:[#allocation10 + $0x78] sm:$0xff]  }
 0x107   :  { %488 = vmatprep.subr.bf16.mxu0 %v1335_v47  ;;  %725 = vmatprep.subr.bf16.mxu1 %v1383_v36  ;;  %v1409_v47 = vld [vmem:[#allocation10 + $0xd8] sm:$0xff]  }
 0x10a   :  { %489 = vmatpush1.bf16.msra.mxu0 %v1333_v48  ;;  %726 = vmatpush1.bf16.msra.mxu1 %v1381_v37  ;;  %v1410_v48 = vld [vmem:[#allocation10 + $0x98] sm:$0xff]  }
 0x10b   :  { %490 = vmatprep.subr.bf16.mxu0 %v1338_v49  ;;  %727 = vmatprep.subr.bf16.mxu1 %v1386_v38  ;;  %v1411_v49 = vld [vmem:[#allocation10 + $0xe0] sm:$0xff]  }
 0x10e   :  { %491 = vmatpush1.bf16.msra.mxu0 %v1336_v50  ;;  %728 = vmatpush1.bf16.msra.mxu1 %v1384_v39  ;;  %v1412_v50 = vld [vmem:[#allocation10 + $0xa0] sm:$0xff]  }
 0x10f   :  { %1248 = vmatprep.subr.bf16.mxu1 %v1387_v40  ;;  %1226 = vmatprep.subr.bf16.mxu0 %v1403_v41 }
 0x1a4   :  { %v192_v22 = vpop.f32.mrb[0].mxu0  ;;  %v1681_v23 = vpop.f32.mrb[0].mxu1 }
 0x1a5   :  { %v251_v24 = vadd.f32 %v244_v20, %v192_v22  ;;  %v194_v25 = vpop.f32.mrb[1].mxu0  ;;  %v1683_v26 = vpop.f32.mrb[1].mxu1  ;;  %v1416_v20 = vld [vmem:[#allocation10 + $0xb0] sm:$0xff]   ;;  %v1418_v22 = vld [vmem:[#allocation10 + $0xb8] sm:$0xff]  }
 0x1a6   :  { %v252_v27 = vadd.f32 %v248_v21, %v194_v25  ;;  %v196_v28 = vpop.f32.mrb[2].mxu0  ;;  %v237_v29 = vpop.f32.mrb[2].mxu1  ;;  %v1417_v21 = vld [vmem:[#allocation10 + $0xf8] sm:$0xff]  }
 0x1a7   :  { %v253_v30 = vmax.f32 %v251_v24, 0.0  ;;  %v197_v31 = vpop.f32.mrb[3].mxu0  ;;  %v238_v32 = vpop.f32.mrb[3].mxu1  ;;  %v1116_v24 = vld [vmem:[%s1717_s5 + $0x2] ss:$4 sm:$0x3] }
 0x1a8   :  { %v254_v33 = vmax.f32 %v252_v27, 0.0  ;;  %v742_v25 = vrot.slane %v1116_v24, %v1672_v17  ;;  %v746_v28 = vrot.slane %v1116_v24, %v1677_v19 }
 0x1a9   :  { %v255_v35 = vpack.c.bf16 %v253_v30, %v253_v30 }
 0x1aa   :  { %v256_v34 = vpack.c.bf16 %v254_v33, %v254_v33 }
 0x1ac   :  { %492 = vmatprep.mubr.bf16.mxu0 %v256_v34 }
 0x1ad   :  { %493 = vmatmul.mubr.bf16.vlgmr.msra.gmra.mrb[4].mxu0 %v255_v35 }
 0x1ae   :  { %1227 = vmatpush3.bf16.msra.mxu0 %v1404_v42 }
 0x1af   :  { %1228 = vmatprep.subr.bf16.mxu0 %v1405_v43 }
 0x1b2   :  { %1229 = vmatpush3.bf16.msra.mxu0 %v1406_v44 }
 0x1b3   :  { %1230 = vmatprep.subr.bf16.mxu0 %v1407_v45 }
 0x1b6   :  { %1231 = vmatpush3.bf16.msra.mxu0 %v1408_v46 }
 0x1b7   :  { %1232 = vmatprep.subr.bf16.mxu0 %v1409_v47 }
 0x1ba   :  { %1233 = vmatpush3.bf16.msra.mxu0 %v1410_v48 }
 0x1bb   :  { %1234 = vmatprep.subr.bf16.mxu0 %v1411_v49 }
 0x1be   :  { %1235 = vmatpush3.bf16.msra.mxu0 %v1412_v50 }
 0x1bf   :  { %1236 = vmatprep.subr.bf16.mxu0 %v1413_v51 }
 0x1c2   :  { %1237 = vmatpush3.bf16.msra.mxu0 %v1414_v16 }
 0x1c3   :  { %1238 = vmatprep.subr.bf16.mxu0 %v1415_v18 }
 0x1c6   :  { %1239 = vmatpush3.bf16.msra.mxu0 %v1416_v20 }
 0x1c7   :  { %1240 = vmatprep.subr.bf16.mxu0 %v1417_v21 }
 0x1ca   :  { %1241 = vmatpush3.bf16.msra.mxu0 %v1418_v22 }
 0x280   :  { %v494_v55 = vpop.f32.mrb[4].mxu0 }
 0x281   :  { %v495_v56 = vadd.f32 %v494_v55, %v293_v53  ;;  %v496_v57 = vpop.f32.mrb[5].mxu0 }
 0x282   :  { %v497_v58 = vadd.f32 %v496_v57, %v297_v54  ;;  %v498_v59 = vpop.f32.mrb[6].mxu0 }
 0x283   :  { %v501_v60 = vmax.f32 %v495_v56, 0.0  ;;  %v499_v61 = vpop.f32.mrb[7].mxu0 }
 0x284   :  { %v502_v62 = vmax.f32 %v497_v58, 0.0 }
 0x285   :  { %v503_v1 = vpack.c.bf16 %v501_v60, %v501_v60 }
 0x286   :  { %v504_v63 = vpack.c.bf16 %v502_v62, %v502_v62 }
 0x288   :  { %729 = vmatprep.mubr.bf16.mxu1 %v504_v63 }
 0x289   :  { %730 = vmatmul.mubr.bf16.vlgmr.msra.gmra.mrb[4].mxu1 %v503_v1 }
 0x28a   :  { %1249 = vmatpush3.bf16.msra.mxu1 %v1388_v0  ;;  %1083 = vmatprep.mubr.bf16.mxu1 %v504_v63 }
 0x28b   :  { %1250 = vmatprep.subr.bf16.mxu1 %v1389_v2 }
 0x28e   :  { %1251 = vmatpush3.bf16.msra.mxu1 %v1390_v3 }
 0x28f   :  { %1252 = vmatprep.subr.bf16.mxu1 %v1391_v4 }
 0x292   :  { %1253 = vmatpush3.bf16.msra.mxu1 %v1392_v5 }
 0x293   :  { %1254 = vmatprep.subr.bf16.mxu1 %v1393_v6 }
 0x296   :  { %1255 = vmatpush3.bf16.msra.mxu1 %v1394_v7 }
 0x297   :  { %1256 = vmatprep.subr.bf16.mxu1 %v1395_v8 }
 0x29a   :  { %1257 = vmatpush3.bf16.msra.mxu1 %v1396_v9 }
 0x29b   :  { %1258 = vmatprep.subr.bf16.mxu1 %v1397_v10 }
 0x29e   :  { %1259 = vmatpush3.bf16.msra.mxu1 %v1398_v11 }
 0x29f   :  { %1260 = vmatprep.subr.bf16.mxu1 %v1399_v12 }
 0x2a2   :  { %1261 = vmatpush3.bf16.msra.mxu1 %v1400_v13 }
 0x2a3   :  { %1262 = vmatprep.subr.bf16.mxu1 %v1401_v14 }
 0x2a6   :  { %1263 = vmatpush3.bf16.msra.mxu1 %v1402_v15 }
 0x2a9   :  { %1084 = vmatmul.mubr.bf16.vlgmr.msra.gmra.mrb[8].mxu1 %v503_v1 }
 0x35c   :  { %v731_v27 = vpop.f32.mrb[4].mxu1 }
 0x35d   :  { %v732_v29 = vadd.f32 %v731_v27, %v1681_v23  ;;  %v733_v30 = vpop.f32.mrb[5].mxu1 }
 0x35e   :  { %v734_v31 = vadd.f32 %v733_v30, %v1683_v26  ;;  %v735_v32 = vpop.f32.mrb[6].mxu1  ;;  %v1225_v26 = vld [vmem:[%s1717_s5 + $0x3] ss:$0 sm:$0xff] }
 0x35f   :  { %v749_v33 = vadd.f32 %v742_v25, %v732_v29  ;;  %v736_v34 = vpop.f32.mrb[7].mxu1 }
 0x360   :  { %v750_v35 = vadd.f32 %v746_v28, %v734_v31 }
 0x361   :  { %v751_v36 = vmax.f32 %v749_v33, 0.0 }
 0x362   :  { %v752_v37 = vmax.f32 %v750_v35, 0.0 }
 0x363   :  { %v785_v39 = vpack.c.bf16 %v751_v36, %v751_v36 }
 0x364   :  { %v786_v38 = vpack.c.bf16 %v752_v37, %v752_v37 }
 0x366   :  { %947 = vmatprep.mubr.bf16.mxu0 %v786_v38 }
 0x367   :  { %948 = vmatmul.mubr.bf16.vlgmr.msra.gmra.mrb[8].mxu0 %v785_v39 }
 0x37c   :  { %v1264_v40 = vpop.f32.mrb[8].mxu1 }
 0x37d   :  { %v1265_v17 = vpop.f32.mrb[9].mxu1 }
 0x37e   :  { %v1266_v41 = vadd.f32 %v1265_v17, %v1264_v40  ;;  %v1267_v42 = vpop.f32.mrb[10].mxu1 }
 0x37f   :  { %v1268_v19 = vpop.f32.mrb[11].mxu1 }
 0x43a   :  { %v1242_v43 = vpop.f32.mrb[8].mxu0 }
 0x43b   :  { %v1243_v23 = vpop.f32.mrb[9].mxu0 }
 0x43c   :  { %v1244_v44 = vadd.f32 %v1243_v23, %v1242_v43  ;;  %v1245_v45 = vpop.f32.mrb[10].mxu0 }
 0x43d   :  { %v1246_v46 = vpop.f32.mrb[11].mxu0 }
 0x43e   :  { %v1086_v47 = vadd.f32 %v1266_v41, %v1244_v44 }
 0x440   :  { %v1095_v48 = vadd.f32 %v1225_v26, %v1086_v47 }
 0x442   :  { %1097 = vst.msk [vmem:[#allocation11] sm:$0xff] %vm1096_vm3, %v1095_v48 }
 0x443   :  { %1540 = shalt.err (!%p1537_p2)
}
 0x444   :  { %s1541_s1 = scalar_lea.hbm %s1718_s6, 128 }
 0x445   :  { %p1542_p3 = scmp.ne.s32.totalorder %s1718_s6, %s1541_s1  ;;  %p1545_p4 = scmp.lt.u32.totalorder %s1541_s1, %s1718_s6 }
 0x447   :  { %p1547_p5 = pnand %p1545_p4, %p1542_p3 }
 0x449   :  { %1550 = shalt.err (!%p1547_p5)
}
 0x44a   :  { %1107 = dma.vmem_to_hbm [thread:$0]  %s1105_s16, 128, %s1718_s6, [#allocation4]  }
 0x44b   :  { %1557 = dma.done.wait [#allocation4], 128  }
 0x44c   :  { %1558 = vsyncadd [#allocation4], 4294967168 }
 0x44d   :  { %1111 = vsyncpa [#allocation3], 1 }
 0x44e   :  { %1112 = vsyncpa [#allocation6], 1 }
 0x44f   :  { %1113 = vsyncpa [#allocation9], 1 }
 0x450   :  { %1114 = vsyncpa [#allocation4], 1 }

</bundles_post_ra>
